<compile_context>
chip_gen: v5e
topology: v5e:2x2
jax: 0.10.0
libtpu: 0.0.40
codegen_flags: <defaults>
</compile_context>

<pallas_src>
import functools

import jax
import jax.numpy as jnp
from jax import lax
from jax.experimental import pallas as pl
from jax.experimental.pallas import tpu as pltpu


def _mlp_kernel(x_ref, w1_ref, b1_ref, w2_ref, b2_ref, o_ref):
    # x_ref:  [TB, D]  (bf16) batch tile: batch on sublanes, features on lanes
    # w1_ref: [D,  H]  (bf16) fc1 weight (transposed vs torch), resident
    # b1_ref: [1,  H]  (f32)  fc1 bias
    # w2_ref: [1,  H]  (f32)  fc2 weight as a row vector
    # b2_ref: [1,  1]  (f32)  fc2 bias
    # o_ref:  [1, TB]  (f32)  lane-dense row of probabilities for this tile
    h = jnp.dot(x_ref[...], w1_ref[...], preferred_element_type=jnp.float32)
    h = jnp.maximum(h + b1_ref[...], 0.0)                    # bias + ReLU (f32, VPU)

    # fc2: contract the hidden axis of w2 (dim 1) with the hidden axis of h
    # (dim 1)  ==  w2_row @ h^T on the MXU.  The [1, TB] result lands lane-dense
    # so the store below is an unmasked full-width vst (no [TB, 1] column).
    logit = lax.dot_general(
        w2_ref[...], h,
        dimension_numbers=(((1,), (1,)), ((), ())),
        preferred_element_type=jnp.float32,
    ) + b2_ref[...]                                          # [1, TB]

    # sigmoid: exp runs on the EUP; reciprocal kept exact (the row is tiny, so
    # approx=True EUP rcp buys nothing here and would cost ~2^-12 accuracy).
    o_ref[...] = pl.reciprocal(1.0 + jnp.exp(-logit), approx=False)


@functools.partial(jax.jit, static_argnames=("block_b", "compute_dtype"))
def semantic_entropy_prob_spec(x, w1, b1, w2, b2, *, block_b=512,
                               compute_dtype=jnp.bfloat16):
    """x: [B, D] -> [B] float32 probabilities = sigmoid(fc2(relu(fc1(x))))."""
    B, D = x.shape
    H = w1.shape[1]

    # Arbitrary batch sizes: ceil-divide the grid and zero-pad the tail tile
    # (padded rows are computed and then sliced away).
    num_tiles = pl.cdiv(B, block_b)
    padded_b = num_tiles * block_b
    if padded_b != B:
        x = jnp.pad(x, ((0, padded_b - B), (0, 0)))

    # bf16 for the bandwidth-dominant stream (x) and the fc1 weight; all math
    # after the f32-accumulating matmul stays in f32.
    x = x.astype(compute_dtype)
    w1_c = w1.astype(compute_dtype)
    b1_2d = b1.reshape(1, H).astype(jnp.float32)
    w2_row = w2.reshape(1, H).astype(jnp.float32)
    b2_2d = b2.reshape(1, 1).astype(jnp.float32)

    out = pl.pallas_call(
        _mlp_kernel,
        out_shape=jax.ShapeDtypeStruct((num_tiles, block_b), jnp.float32),
        grid=(num_tiles,),
        in_specs=[
            pl.BlockSpec((block_b, D), lambda i: (i, 0)),   # x batch tile
            pl.BlockSpec((D, H), lambda i: (0, 0)),         # w1 (resident)
            pl.BlockSpec((1, H), lambda i: (0, 0)),         # b1
            pl.BlockSpec((1, H), lambda i: (0, 0)),         # w2 row
            pl.BlockSpec((1, 1), lambda i: (0, 0)),         # b2
        ],
        # Lane-dense output: one [1, block_b] row per batch tile.
        out_specs=pl.BlockSpec((1, block_b), lambda i: (i, 0)),
        compiler_params=pltpu.CompilerParams(
            dimension_semantics=("parallel",),       # batch tiles -> both TCs on v7x
            vmem_limit_bytes=48 * 1024 * 1024,       # > 16/32 MiB scoped defaults,
                                                     # < v7x 64 MiB physical VMEM
        ),
    )(x, w1_c, b1_2d, w2_row, b2_2d)

    return out.reshape(padded_b)[:B]                 # squeeze(-1) + drop padding


def _reference(x, w1, b1, w2, b2, compute_dtype=jnp.bfloat16):
    # Mirrors the kernel's precision policy (bf16 inputs, f32 accumulation).
    h = jnp.dot(x.astype(compute_dtype), w1.astype(compute_dtype),
                preferred_element_type=jnp.float32) + b1
    h = jnp.maximum(h, 0.0)
    logit = jnp.dot(h, w2.reshape(-1, 1).astype(jnp.float32),
                    preferred_element_type=jnp.float32,
                    precision=lax.Precision.HIGHEST) + b2
    return jax.nn.sigmoid(logit)[:, 0]


if __name__ == "__main__":
    key = jax.random.PRNGKey(0)
    kx, k1, kb1, k2, kb2 = jax.random.split(key, 5)

    # Small shapes consistent with the module (Linear(D, H) -> Linear(H, 1)).
    input_dim, hidden_dim, batch = 32, 32, 8
    x = jax.random.normal(kx, (batch, input_dim), dtype=jnp.float32)
    w1 = jax.random.normal(k1, (input_dim, hidden_dim), dtype=jnp.float32) * 0.1
    b1 = jax.random.normal(kb1, (hidden_dim,), dtype=jnp.float32) * 0.1
    w2 = jax.random.normal(k2, (hidden_dim, 1), dtype=jnp.float32) * 0.1
    b2 = jax.random.normal(kb2, (1,), dtype=jnp.float32) * 0.1

    out = semantic_entropy_prob_spec(x, w1, b1, w2, b2)
    out = jax.block_until_ready(out)
    ref = _reference(x, w1, b1, w2, b2)
    assert out.shape == (batch,)
    # Tolerance covers MXU multi-pass / accumulation-order differences between
    # the Mosaic kernel and the XLA reference under the same bf16-input policy.
    assert jnp.allclose(out, ref, atol=5e-4, rtol=5e-4), (out, ref)

    # Second check: batch not a multiple of block_b and a multi-step grid
    # (exercises the pl.cdiv padding path and the per-tile lane-dense mapping).
    x2 = jax.random.normal(kx, (260, input_dim), dtype=jnp.float32)
    out2 = jax.block_until_ready(
        semantic_entropy_prob_spec(x2, w1, b1, w2, b2, block_b=128))
    ref2 = _reference(x2, w1, b1, w2, b2)
    assert out2.shape == (260,)
    assert jnp.allclose(out2, ref2, atol=5e-4, rtol=5e-4), (out2, ref2)

    print("KERNEL_OK")
</pallas_src>

<mosaic_0001>
module attributes {stable_mosaic.version = 11 : i64} {
  func.func @_mlp_kernel(%arg0: i32, %arg1: memref<512x32xbf16, #tpu.memory_space<vmem>>, %arg2: memref<32x32xbf16, #tpu.memory_space<vmem>>, %arg3: memref<1x32xf32, #tpu.memory_space<vmem>>, %arg4: memref<1x32xf32, #tpu.memory_space<vmem>>, %arg5: memref<1x1xf32, #tpu.memory_space<vmem>>, %arg6: memref<1x512xf32, #tpu.memory_space<vmem>>) attributes {dimension_semantics = [#tpu.dimension_semantics<parallel>], iteration_bounds = array<i64: 1>, scalar_prefetch = 0 : i64, scratch_operands = 0 : i64, tpu.core_type = #tpu.core_type<tc>, window_params = [{transform_indices = @transform_0, window_bounds = array<i64: 512, 32>}, {pipeline_mode = #tpu.pipeline_mode<synchronous>, transform_indices = @transform_1, window_bounds = array<i64: 32, 32>}, {pipeline_mode = #tpu.pipeline_mode<synchronous>, transform_indices = @transform_2, window_bounds = array<i64: 1, 32>}, {pipeline_mode = #tpu.pipeline_mode<synchronous>, transform_indices = @transform_3, window_bounds = array<i64: 1, 32>}, {pipeline_mode = #tpu.pipeline_mode<synchronous>, transform_indices = @transform_4, window_bounds = array<i64: 1, 1>}, {transform_indices = @transform_5, window_bounds = array<i64: 1, 512>}]} {
    %c0 = arith.constant 0 : index
    %c0_0 = arith.constant 0 : index
    %0 = vector.load %arg1[%c0, %c0_0] : memref<512x32xbf16, #tpu.memory_space<vmem>>, vector<512x32xbf16>
    %c0_1 = arith.constant 0 : index
    %c0_2 = arith.constant 0 : index
    %1 = vector.load %arg2[%c0_1, %c0_2] : memref<32x32xbf16, #tpu.memory_space<vmem>>, vector<32x32xbf16>
    %cst = arith.constant dense<0.000000e+00> : vector<512x32xf32>
    %2 = tpu.matmul %0, %1, %cst {dimension_numbers = #tpu.dot_dimension_numbers<[1], [0], [0], [1], [0, 0, 1, 1], [], []>} : vector<512x32xbf16>, vector<32x32xbf16>, vector<512x32xf32> -> vector<512x32xf32>
    %c0_3 = arith.constant 0 : index
    %c0_4 = arith.constant 0 : index
    %3 = vector.load %arg3[%c0_3, %c0_4] : memref<1x32xf32, #tpu.memory_space<vmem>>, vector<1x32xf32>
    %4 = vector.broadcast %3 : vector<1x32xf32> to vector<512x32xf32>
    %5 = arith.addf %2, %4 : vector<512x32xf32>
    %cst_5 = arith.constant 0.000000e+00 : f32
    %6 = vector.broadcast %cst_5 : f32 to vector<512x32xf32>
    %7 = arith.maximumf %5, %6 : vector<512x32xf32>
    %c0_6 = arith.constant 0 : index
    %c0_7 = arith.constant 0 : index
    %8 = vector.load %arg4[%c0_6, %c0_7] : memref<1x32xf32, #tpu.memory_space<vmem>>, vector<1x32xf32>
    %cst_8 = arith.constant dense<0.000000e+00> : vector<1x512xf32>
    %9 = tpu.matmul %8, %7, %cst_8 {dimension_numbers = #tpu.dot_dimension_numbers<[1], [1], [0], [0], [0, 0, 1, 0], [], []>} : vector<1x32xf32>, vector<512x32xf32>, vector<1x512xf32> -> vector<1x512xf32>
    %c0_9 = arith.constant 0 : index
    %c0_10 = arith.constant 0 : index
    %10 = vector.load %arg5[%c0_9, %c0_10] : memref<1x1xf32, #tpu.memory_space<vmem>>, vector<1x1xf32>
    %11 = vector.broadcast %10 : vector<1x1xf32> to vector<1x512xf32>
    %12 = arith.addf %9, %11 : vector<1x512xf32>
    %cst_11 = arith.constant 0.000000e+00 : f32
    %13 = vector.broadcast %cst_11 : f32 to vector<1x512xf32>
    %14 = arith.subf %13, %12 : vector<1x512xf32>
    %15 = math.exp %14 : vector<1x512xf32>
    %cst_12 = arith.constant 1.000000e+00 : f32
    %16 = vector.broadcast %cst_12 : f32 to vector<1x512xf32>
    %17 = arith.addf %16, %15 : vector<1x512xf32>
    %18 = tpu.reciprocal %17 : vector<1x512xf32> -> vector<1x512xf32>
    %c0_13 = arith.constant 0 : index
    %c0_14 = arith.constant 0 : index
    %19 = vector.load %arg6[%c0_13, %c0_14] : memref<1x512xf32, #tpu.memory_space<vmem>>, vector<1x512xf32>
    tpu.vector_store %arg6[%c0_13, %c0_14], %18 {strides = array<i32>} : memref<1x512xf32, #tpu.memory_space<vmem>>, vector<1x512xf32>,
    return
  }
  func.func @transform_0(%arg0: i32) -> (i32, i32) {
    %c0_i32 = arith.constant 0 : i32
    %c0_i32_0 = arith.constant 0 : i32
    return %arg0, %c0_i32 : i32, i32
  }
  func.func @transform_1(%arg0: i32) -> (i32, i32) {
    %c0_i32 = arith.constant 0 : i32
    %c0_i32_0 = arith.constant 0 : i32
    %c0_i32_1 = arith.constant 0 : i32
    return %c0_i32, %c0_i32_0 : i32, i32
  }
  func.func @transform_2(%arg0: i32) -> (i32, i32) {
    %c0_i32 = arith.constant 0 : i32
    %c0_i32_0 = arith.constant 0 : i32
    %c0_i32_1 = arith.constant 0 : i32
    return %c0_i32, %c0_i32_0 : i32, i32
  }
  func.func @transform_3(%arg0: i32) -> (i32, i32) {
    %c0_i32 = arith.constant 0 : i32
    %c0_i32_0 = arith.constant 0 : i32
    %c0_i32_1 = arith.constant 0 : i32
    return %c0_i32, %c0_i32_0 : i32, i32
  }
  func.func @transform_4(%arg0: i32) -> (i32, i32) {
    %c0_i32 = arith.constant 0 : i32
    %c0_i32_0 = arith.constant 0 : i32
    %c0_i32_1 = arith.constant 0 : i32
    return %c0_i32, %c0_i32_0 : i32, i32
  }
  func.func @transform_5(%arg0: i32) -> (i32, i32) {
    %c0_i32 = arith.constant 0 : i32
    %c0_i32_0 = arith.constant 0 : i32
    return %arg0, %c0_i32 : i32, i32
  }
}

</mosaic_0001>

<bundles_post_ra>
// kernel: semantic_entropy_prob_spec.1
= control target key start
LH: loop header
LB: loop body
LE: loop exit
PB: predicated region body
PF: predicated region fallthrough
CT: control target
= control target key end

     0   :  { %vm267_vm0 = vcmask 261120   ;;  %s1711_s1 = inlined_call_operand.vmem [shape: bf16[32,32], index: 1, kind: input, shape index: {}]   ;;  %s1712_s0 = inlined_call_operand.vmem [shape: bf16[512,32], index: 0, kind: input, shape index: {}]   ;;  %s1713_s2 = inlined_call_operand.vmem [shape: f32[1,32], index: 2, kind: input, shape index: {}]   ;;  %s1714_s3 = inlined_call_operand.vmem [shape: f32[1,32], index: 3, kind: input, shape index: {}]   ;;  %s1715_s4 = inlined_call_operand.<no memory space> [shape: f32[1,1], index: 4, kind: input, shape index: {}]   ;;  %s1716_s5 = inlined_call_operand.vmem [shape: f32[1,512], index: 5, kind: output, shape index: {}]  }
   0x1   :  { %v1244_v0 = vld [vmem:[%s1711_s1 + $0x8] sm:$0xff]  ;;  %v1243_v1 = vld [vmem:[%s1711_s1] sm:$0xff]  ;;  %v1233_v4 = vld [vmem:[%s1712_s0 + $0xb0] sm:$0xff] }
   0x2   :  { %370 = vmatpush.bf16.msra.mxu0 %v1244_v0  ;;  %1245 = vmatpush.bf16.msra.mxu2 %v1244_v0  ;;  %v1211_v2 = vld [vmem:[%s1712_s0] sm:$0xff]  ;;  %v1212_v5 = vld [vmem:[%s1712_s0 + $0x8] sm:$0xff]  ;;  %v1234_v7 = vld [vmem:[%s1712_s0 + $0xb8] sm:$0xff] }
   0x3   :  { %1246 = vmatpush.bf16.msra.mxu3 %v1244_v0  ;;  %v1223_v3 = vld [vmem:[%s1712_s0 + $0x60] sm:$0xff]  ;;  %v1224_v6 = vld [vmem:[%s1712_s0 + $0x68] sm:$0xff]  ;;  %v1213_v8 = vld [vmem:[%s1712_s0 + $0x10] sm:$0xff] }
   0x4   :  { %v1225_v9 = vld [vmem:[%s1712_s0 + $0x70] sm:$0xff]  ;;  %v1235_v10 = vld [vmem:[%s1712_s0 + $0xc0] sm:$0xff]  ;;  %v1214_v11 = vld [vmem:[%s1712_s0 + $0x18] sm:$0xff] }
   0x5   :  { %v1226_v12 = vld [vmem:[%s1712_s0 + $0x78] sm:$0xff]  ;;  %v1236_v13 = vld [vmem:[%s1712_s0 + $0xc8] sm:$0xff]  ;;  %v1215_v14 = vld [vmem:[%s1712_s0 + $0x20] sm:$0xff] }
   0x6   :  { %371 = vmatpush.bf16.msra.mxu0 %v1243_v1  ;;  %1247 = vmatpush.bf16.msra.mxu2 %v1243_v1  ;;  %v1227_v15 = vld [vmem:[%s1712_s0 + $0x80] sm:$0xff]  ;;  %v1237_v16 = vld [vmem:[%s1712_s0 + $0xd0] sm:$0xff]  ;;  %v1216_v17 = vld [vmem:[%s1712_s0 + $0x28] sm:$0xff] }
   0x7   :  { %1248 = vmatpush.bf16.msra.mxu3 %v1243_v1  ;;  %v1228_v18 = vld [vmem:[%s1712_s0 + $0x88] sm:$0xff]  ;;  %v1238_v19 = vld [vmem:[%s1712_s0 + $0xd8] sm:$0xff]  ;;  %v1217_v20 = vld [vmem:[%s1712_s0 + $0x30] sm:$0xff] }
   0x8   :  { %v1229_v21 = vld [vmem:[%s1712_s0 + $0x90] sm:$0xff]  ;;  %v1239_v22 = vld [vmem:[%s1712_s0 + $0xe0] sm:$0xff]  ;;  %v1218_v23 = vld [vmem:[%s1712_s0 + $0x38] sm:$0xff] }
   0x9   :  { %1111 = vmatmul.msk.bf16.vlgmr.msra.gmra.mxu0 %vm267_vm0, %v1211_v2  ;;  %1123 = vmatmul.msk.bf16.vlgmr.msra.gmra.mxu2 %vm267_vm0, %v1223_v3  ;;  %v1230_v24 = vld [vmem:[%s1712_s0 + $0x98] sm:$0xff]  ;;  %v1240_v25 = vld [vmem:[%s1712_s0 + $0xe8] sm:$0xff]  ;;  %v1219_v26 = vld [vmem:[%s1712_s0 + $0x40] sm:$0xff] }
   0xa   :  { %1133 = vmatmul.msk.bf16.vlgmr.msra.gmra.mxu3 %vm267_vm0, %v1233_v4  ;;  %v1231_v27 = vld [vmem:[%s1712_s0 + $0xa0] sm:$0xff]  ;;  %v1241_v29 = vld [vmem:[%s1712_s0 + $0xf0] sm:$0xff]  ;;  %v1220_v34 = vld [vmem:[%s1712_s0 + $0x48] sm:$0xff] }
   0xb   :  { %v1232_v35 = vld [vmem:[%s1712_s0 + $0xa8] sm:$0xff]  ;;  %v1242_v38 = vld [vmem:[%s1712_s0 + $0xf8] sm:$0xff]  ;;  %v1440_v42 = vld [vmem:[%s1713_s2] ss:$0 sm:$0xff] }
   0xc   :  { %v1221_v44 = vld [vmem:[%s1712_s0 + $0x50] sm:$0xff]  ;;  %v1222_v59 = vld [vmem:[%s1712_s0 + $0x58] sm:$0xff] }
  0x19   :  { %1112 = vmatmul.msk.bf16.gmra.mxu0 %vm267_vm0, %v1212_v5  ;;  %1124 = vmatmul.msk.bf16.gmra.mxu2 %vm267_vm0, %v1224_v6 }
  0x1a   :  { %1134 = vmatmul.msk.bf16.gmra.mxu3 %vm267_vm0, %v1234_v7 }
  0x29   :  { %1113 = vmatmul.msk.bf16.gmra.mxu0 %vm267_vm0, %v1213_v8  ;;  %1125 = vmatmul.msk.bf16.gmra.mxu2 %vm267_vm0, %v1225_v9 }
  0x2a   :  { %1135 = vmatmul.msk.bf16.gmra.mxu3 %vm267_vm0, %v1235_v10 }
  0x39   :  { %1114 = vmatmul.msk.bf16.gmra.mxu0 %vm267_vm0, %v1214_v11  ;;  %1126 = vmatmul.msk.bf16.gmra.mxu2 %vm267_vm0, %v1226_v12 }
  0x3a   :  { %1136 = vmatmul.msk.bf16.gmra.mxu3 %vm267_vm0, %v1236_v13 }
  0x49   :  { %1115 = vmatmul.msk.bf16.gmra.mxu0 %vm267_vm0, %v1215_v14  ;;  %1127 = vmatmul.msk.bf16.gmra.mxu2 %vm267_vm0, %v1227_v15 }
  0x4a   :  { %1137 = vmatmul.msk.bf16.gmra.mxu3 %vm267_vm0, %v1237_v16 }
  0x59   :  { %1116 = vmatmul.msk.bf16.gmra.mxu0 %vm267_vm0, %v1216_v17  ;;  %1128 = vmatmul.msk.bf16.gmra.mxu2 %vm267_vm0, %v1228_v18 }
  0x5a   :  { %1138 = vmatmul.msk.bf16.gmra.mxu3 %vm267_vm0, %v1238_v19 }
  0x69   :  { %1117 = vmatmul.msk.bf16.gmra.mxu0 %vm267_vm0, %v1217_v20  ;;  %1129 = vmatmul.msk.bf16.gmra.mxu2 %vm267_vm0, %v1229_v21 }
  0x6a   :  { %1139 = vmatmul.msk.bf16.gmra.mxu3 %vm267_vm0, %v1239_v22 }
  0x79   :  { %1118 = vmatmul.msk.bf16.gmra.mxu0 %vm267_vm0, %v1218_v23  ;;  %1130 = vmatmul.msk.bf16.gmra.mxu2 %vm267_vm0, %v1230_v24 }
  0x7a   :  { %1140 = vmatmul.msk.bf16.gmra.mxu3 %vm267_vm0, %v1240_v25 }
  0x86   :  { %v1407_v28 = vpop.f32.mrf.mxu0 }
  0x89   :  { %1119 = vmatmul.msk.bf16.gmra.mxu0 %vm267_vm0, %v1219_v26  ;;  %1131 = vmatmul.msk.bf16.gmra.mxu2 %vm267_vm0, %v1231_v27 }
  0x8a   :  { %1141 = vmatmul.msk.bf16.gmra.mxu3 %vm267_vm0, %v1241_v29 }
  0x8c   :  { %v1415_v30 = vpop.f32.mrf.mxu2 }
  0x8d   :  { %v483_v31 = vpop.f32.mrf.mxu3  ;;  %v434_v26 = vadd.f32 %v1440_v42, %v1415_v30 }
  0x8e   :  { %v1417_v32 = vpop.f32.mrf.mxu0  ;;  %v484_v55 = vadd.f32 %v1440_v42, %v483_v31 }
  0x8f   :  { %v557_v29 = vmax.f32 %v434_v26, 0.0 }
  0x90   :  { %v577_v57 = vmax.f32 %v484_v55, 0.0 }
  0x94   :  { %v1419_v33 = vpop.f32.mrf.mxu2 }
  0x95   :  { %v485_v36 = vpop.f32.mrf.mxu3  ;;  %v436_v21 = vadd.f32 %v1440_v42, %v1419_v33 }
  0x96   :  { %v1427_v37 = vpop.f32.mrf.mxu0  ;;  %v486_v51 = vadd.f32 %v1440_v42, %v485_v36 }
  0x97   :  { %v558_v27 = vmax.f32 %v436_v21, 0.0 }
  0x98   :  { %v578_v56 = vmax.f32 %v486_v51, 0.0 }
  0x99   :  { %1120 = vmatmul.msk.bf16.gmra.mxu0 %vm267_vm0, %v1220_v34  ;;  %1132 = vmatmul.msk.bf16.gmra.mxu2 %vm267_vm0, %v1232_v35 }
  0x9a   :  { %1142 = vmatmul.msk.bf16.gmra.mxu3 %vm267_vm0, %v1242_v38 }
  0x9c   :  { %v438_v39 = vpop.f32.mrf.mxu2 }
  0x9d   :  { %v488_v40 = vpop.f32.mrf.mxu3  ;;  %v439_v19 = vadd.f32 %v1440_v42, %v438_v39 }
  0x9e   :  { %v1435_v41 = vpop.f32.mrf.mxu0  ;;  %v489_v47 = vadd.f32 %v1440_v42, %v488_v40 }
  0x9f   :  { %v559_v22 = vmax.f32 %v439_v19, 0.0 }
  0xa0   :  { %v579_v50 = vmax.f32 %v489_v47, 0.0 }
  0xa4   :  { %v440_v43 = vpop.f32.mrf.mxu2 }
  0xa5   :  { %v490_v45 = vpop.f32.mrf.mxu3  ;;  %v441_v14 = vadd.f32 %v1440_v42, %v440_v43 }
  0xa6   :  { %v1445_v46 = vpop.f32.mrf.mxu0  ;;  %v491_v48 = vadd.f32 %v1440_v42, %v490_v45 }
  0xa7   :  { %v560_v20 = vmax.f32 %v441_v14, 0.0 }
  0xa8   :  { %v580_v49 = vmax.f32 %v491_v48, 0.0 }
  0xa9   :  { %1121 = vmatmul.msk.bf16.gmra.mxu0 %vm267_vm0, %v1221_v44 }
  0xaa   :  { %1177 = vmatpush.xpose.msk.msrb.mxu3 %vm267_vm0, %v580_v49 }
  0xac   :  { %v443_v52 = vpop.f32.mrf.mxu2 }
  0xad   :  { %v1452_v53 = vpop.f32.mrf.mxu3  ;;  %v444_v13 = vadd.f32 %v1440_v42, %v443_v52 }
  0xae   :  { %v1454_v54 = vpop.f32.mrf.mxu0  ;;  %1178 = vmatpush.xpose.msk.msrb.mxu3 %vm267_vm0, %v579_v50 }
  0xaf   :  { %v561_v15 = vmax.f32 %v444_v13, 0.0 }
  0xb2   :  { %1179 = vmatpush.xpose.msk.msrb.mxu3 %vm267_vm0, %v578_v56 }
  0xb4   :  { %v445_v58 = vpop.f32.mrf.mxu2 }
  0xb5   :  { %v1462_v60 = vpop.f32.mrf.mxu3  ;;  %v446_v7 = vadd.f32 %v1440_v42, %v445_v58 }
  0xb6   :  { %v1464_v61 = vpop.f32.mrf.mxu0  ;;  %1180 = vmatpush.xpose.msk.msrb.mxu3 %vm267_vm0, %v577_v57 }
  0xb7   :  { %v562_v10 = vmax.f32 %v446_v7, 0.0 }
  0xb9   :  { %1122 = vmatmul.msk.bf16.gmra.mxu0 %vm267_vm0, %v1222_v59 }
  0xbc   :  { %v448_v62 = vpop.f32.mrf.mxu2 }
  0xbd   :  { %v1468_v63 = vpop.f32.mrf.mxu3  ;;  %v449_v2 = vadd.f32 %v1440_v42, %v448_v62 }
  0xbe   :  { %v1470_v0 = vpop.f32.mrf.mxu0 }
  0xbf   :  { %v563_v8 = vmax.f32 %v449_v2, 0.0 }
  0xc4   :  { %v450_v1 = vpop.f32.mrf.mxu2 }
  0xc5   :  { %v451_v3 = vadd.f32 %v1440_v42, %v450_v1  ;;  %v1474_v4 = vpop.f32.mrf.mxu3 }
  0xc6   :  { %v1476_v5 = vpop.f32.mrf.mxu0 }
  0xc7   :  { %v564_v6 = vmax.f32 %v451_v3, 0.0  ;;  %v394_v14 = vadd.f32 %v1440_v42, %v1476_v5 }
  0xc9   :  { %1160 = vmatpush.xpose.msk.msrb.mxu2 %vm267_vm0, %v564_v6  ;;  %v541_v21 = vmax.f32 %v394_v14, 0.0 }
  0xcc   :  { %v1480_v9 = vpop.f32.mrf.mxu2 }
  0xcd   :  { %1161 = vmatpush.xpose.msk.msrb.mxu2 %vm267_vm0, %v563_v8  ;;  %v1483_v11 = vpop.f32.mrf.mxu3 }
  0xce   :  { %v395_v12 = vpop.f32.mrf.mxu0 }
  0xcf   :  { %v396_v8 = vadd.f32 %v1440_v42, %v395_v12  ;;  %v389_v12 = vadd.f32 %v1440_v42, %v1464_v61  ;;  %v384_v61 = vadd.f32 %v1440_v42, %v1445_v46  ;;  %v379_v46 = vadd.f32 %v1440_v42, %v1427_v37 }
  0xd1   :  { %1162 = vmatpush.xpose.msk.msrb.mxu2 %vm267_vm0, %v562_v10 }
  0xd4   :  { %v1488_v16 = vpop.f32.mrf.mxu2 }
  0xd5   :  { %1163 = vmatpush.xpose.msk.msrb.mxu2 %vm267_vm0, %v561_v15  ;;  %v1491_v17 = vpop.f32.mrf.mxu3  ;;  %v542_v15 = vmax.f32 %v396_v8, 0.0 }
  0xd6   :  { %v398_v18 = vpop.f32.mrf.mxu0 }
  0xd7   :  { %v399_v3 = vadd.f32 %v1440_v42, %v398_v18 }
  0xd9   :  { %1164 = vmatpush.xpose.msk.msrb.mxu2 %vm267_vm0, %v560_v20  ;;  %v543_v10 = vmax.f32 %v399_v3, 0.0  ;;  %v391_v20 = vadd.f32 %v1440_v42, %v1470_v0 }
  0xdc   :  { %v1497_v23 = vpop.f32.mrf.mxu2 }
  0xdd   :  { %1165 = vmatpush.xpose.msk.msrb.mxu2 %vm267_vm0, %v559_v22  ;;  %v1500_v24 = vpop.f32.mrf.mxu3 }
  0xde   :  { %v400_v25 = vpop.f32.mrf.mxu0 }
  0xdf   :  { %v401_v59 = vadd.f32 %v1440_v42, %v400_v25  ;;  %v540_v25 = vmax.f32 %v391_v20, 0.0 }
  0xe1   :  { %1166 = vmatpush.xpose.msk.msrb.mxu2 %vm267_vm0, %v558_v27  ;;  %v544_v6 = vmax.f32 %v401_v59, 0.0  ;;  %v386_v27 = vadd.f32 %v1440_v42, %v1454_v54  ;;  %v381_v54 = vadd.f32 %v1440_v42, %v1435_v41  ;;  %v376_v41 = vadd.f32 %v1440_v42, %v1417_v32 }
  0xe3   :  { %v536_v59 = vmax.f32 %v381_v54, 0.0 }
  0xe4   :  { %v1505_v31 = vpop.f32.mrf.mxu2 }
  0xe5   :  { %1167 = vmatpush.xpose.msk.msrb.mxu2 %vm267_vm0, %v557_v29  ;;  %v1508_v34 = vpop.f32.mrf.mxu3  ;;  %v539_v29 = vmax.f32 %v389_v12, 0.0 }
  0xe6   :  { %v403_v33 = vpop.f32.mrf.mxu0 }
  0xe7   :  { %v404_v56 = vadd.f32 %v1440_v42, %v403_v33 }
  0xe9   :  { %v545_v62 = vmax.f32 %v404_v56, 0.0 }
  0xec   :  { %v1510_v35 = vpop.f32.mrf.mxu2 }
  0xed   :  { %v1512_v38 = vpop.f32.mrf.mxu3 }
  0xee   :  { %v405_v36 = vpop.f32.mrf.mxu0 }
  0xef   :  { %v406_v50 = vadd.f32 %v1440_v42, %v405_v36 }
  0xf1   :  { %v546_v57 = vmax.f32 %v406_v50, 0.0 }
  0xf4   :  { %v1514_v39 = vpop.f32.mrf.mxu2 }
  0xf5   :  { %v1516_v30 = vpop.f32.mrf.mxu3  ;;  %v466_v32 = vadd.f32 %v1440_v42, %v1514_v39 }
  0xf6   :  { %v408_v40 = vpop.f32.mrf.mxu0 }
  0xf7   :  { %v409_v47 = vadd.f32 %v1440_v42, %v408_v40  ;;  %v570_v12 = vmax.f32 %v466_v32, 0.0 }
  0xf9   :  { %v547_v51 = vmax.f32 %v409_v47, 0.0 }
  0xfc   :  { %v1518_v43 = vpop.f32.mrf.mxu2 }
  0xfd   :  { %v1524_v52 = vpop.f32.mrf.mxu3 }
  0xfe   :  { %v410_v44 = vpop.f32.mrf.mxu0 }
  0xff   :  { %v411_v45 = vadd.f32 %v1440_v42, %v410_v44  ;;  %v538_v44 = vmax.f32 %v386_v27, 0.0 }
 0x101   :  { %v548_v48 = vmax.f32 %v411_v45, 0.0 }
 0x103   :  { %1143 = vmatpush.xpose.msk.msra.mxu1 %vm267_vm0, %v548_v48  ;;  %v537_v48 = vmax.f32 %v384_v61, 0.0 }
 0x104   :  { %v470_v49 = vpop.f32.mrf.mxu2 }
 0x105   :  { %v1535_v2 = vpop.f32.mrf.mxu3 }
 0x106   :  { %v1526_v55 = vpop.f32.mrf.mxu0 }
 0x107   :  { %1144 = vmatpush.xpose.msk.msra.mxu1 %vm267_vm0, %v547_v51 }
 0x10b   :  { %1145 = vmatpush.xpose.msk.msra.mxu1 %vm267_vm0, %v546_v57 }
 0x10c   :  { %v473_v58 = vpop.f32.mrf.mxu2 }
 0x10d   :  { %v1545_v19 = vpop.f32.mrf.mxu3  ;;  %v474_v57 = vadd.f32 %v1440_v42, %v473_v58 }
 0x10e   :  { %v1532_v1 = vpop.f32.mrf.mxu0  ;;  %v524_v61 = vadd.f32 %v1440_v42, %v1545_v19  ;;  %v521_v19 = vadd.f32 %v1440_v42, %v1535_v2 }
 0x10f   :  { %1146 = vmatpush.xpose.msk.msra.mxu1 %vm267_vm0, %v545_v62  ;;  %v471_v62 = vadd.f32 %v1440_v42, %v470_v49  ;;  %v573_v3 = vmax.f32 %v474_v57, 0.0  ;;  %v374_v49 = vadd.f32 %v1440_v42, %v1407_v28  ;;  %v464_v28 = vadd.f32 %v1440_v42, %v1510_v35 }
 0x110   :  { %v461_v35 = vadd.f32 %v1440_v42, %v1505_v31  ;;  %v459_v31 = vadd.f32 %v1440_v42, %v1497_v23  ;;  %v456_v23 = vadd.f32 %v1440_v42, %v1488_v16  ;;  %v519_v57 = vadd.f32 %v1440_v42, %v1524_v52 }
 0x111   :  { %v572_v8 = vmax.f32 %v471_v62, 0.0  ;;  %v592_v2 = vmax.f32 %v521_v19, 0.0  ;;  %v516_v52 = vadd.f32 %v1440_v42, %v1516_v30  ;;  %v414_v30 = vadd.f32 %v1440_v42, %v1526_v55 }
 0x112   :  { %v506_v55 = vadd.f32 %v1440_v42, %v1491_v17  ;;  %v499_v17 = vadd.f32 %v1440_v42, %v1468_v63 }
 0x113   :  { %1147 = vmatpush.xpose.msk.msra.mxu1 %vm267_vm0, %v544_v6  ;;  %v535_v6 = vmax.f32 %v379_v46, 0.0  ;;  %v454_v46 = vadd.f32 %v1440_v42, %v1480_v9 }
 0x114   :  { %v475_v7 = vpop.f32.mrf.mxu2  ;;  %v586_v32 = vmax.f32 %v506_v55, 0.0 }
 0x115   :  { %v525_v5 = vpop.f32.mrf.mxu3  ;;  %v476_v45 = vadd.f32 %v1440_v42, %v475_v7  ;;  %v469_v7 = vadd.f32 %v1440_v42, %v1518_v43  ;;  %v565_v9 = vmax.f32 %v454_v46, 0.0 }
 0x116   :  { %v1540_v13 = vpop.f32.mrf.mxu0  ;;  %v526_v27 = vadd.f32 %v1440_v42, %v525_v5 }
 0x117   :  { %1148 = vmatpush.xpose.msk.msra.mxu1 %vm267_vm0, %v543_v10  ;;  %v574_v50 = vmax.f32 %v476_v45, 0.0  ;;  %v534_v10 = vmax.f32 %v376_v41, 0.0  ;;  %v568_v45 = vmax.f32 %v461_v35, 0.0  ;;  %v419_v16 = vadd.f32 %v1440_v42, %v1540_v13 }
 0x118   :  { %v591_v41 = vmax.f32 %v519_v57, 0.0 }
 0x119   :  { %v551_v13 = vmax.f32 %v419_v16, 0.0 }
 0x11b   :  { %1149 = vmatpush.xpose.msk.msra.mxu1 %vm267_vm0, %v542_v15  ;;  %v571_v15 = vmax.f32 %v469_v7, 0.0  ;;  %v590_v7 = vmax.f32 %v516_v52, 0.0 }
 0x11c   :  { %v478_v18 = vpop.f32.mrf.mxu2 }
 0x11d   :  { %v479_v33 = vadd.f32 %v1440_v42, %v478_v18  ;;  %v528_v51 = vpop.f32.mrf.mxu3  ;;  %v533_v18 = vmax.f32 %v374_v49, 0.0  ;;  %v509_v49 = vadd.f32 %v1440_v42, %v1500_v24  ;;  %v501_v24 = vadd.f32 %v1440_v42, %v1474_v4 }
 0x11e   :  { %v1550_v22 = vpop.f32.mrf.mxu0  ;;  %v529_v43 = vadd.f32 %v1440_v42, %v528_v51  ;;  %v567_v51 = vmax.f32 %v459_v31, 0.0 }
 0x11f   :  { %1150 = vmatpush.xpose.msk.msra.mxu1 %vm267_vm0, %v541_v21  ;;  %v575_v47 = vmax.f32 %v479_v33, 0.0  ;;  %v1604_v33 = vld [vmem:[%s1714_s3] sm:$0x1] }
 0x123   :  { %1151 = vmatpush.xpose.msk.msra.mxu1 %vm267_vm0, %v540_v25 }
 0x124   :  { %v480_v26 = vpop.f32.mrf.mxu2 }
 0x125   :  { %v481_v0 = vadd.f32 %v1440_v42, %v480_v26  ;;  %v530_v37 = vpop.f32.mrf.mxu3 }
 0x126   :  { %v1560_v36 = vpop.f32.mrf.mxu0  ;;  %v531_v14 = vadd.f32 %v1440_v42, %v530_v37 }
 0x127   :  { %v576_v40 = vmax.f32 %v481_v0, 0.0  ;;  %1152 = vmatpush.xpose.msk.msra.mxu1 %vm267_vm0, %v539_v29  ;;  %v595_v29 = vmax.f32 %v529_v43, 0.0  ;;  %v569_v0 = vmax.f32 %v464_v28, 0.0  ;;  %v496_v43 = vadd.f32 %v1440_v42, %v1462_v60 }
 0x128   :  { %v596_v20 = vmax.f32 %v531_v14, 0.0  ;;  %v587_v14 = vmax.f32 %v509_v49, 0.0 }
 0x129   :  { %1181 = vmatpush.xpose.msk.msrb.mxu3 %vm267_vm0, %v576_v40 }
 0x12b   :  { %1153 = vmatpush.xpose.msk.msra.mxu1 %vm267_vm0, %v538_v44  ;;  %v594_v44 = vmax.f32 %v526_v27, 0.0 }
 0x12d   :  { %1182 = vmatpush.xpose.msk.msrb.mxu3 %vm267_vm0, %v575_v47  ;;  %v424_v47 = vadd.f32 %v1440_v42, %v1560_v36  ;;  %v421_v36 = vadd.f32 %v1440_v42, %v1550_v22  ;;  %v1268_v22 = vmov 0  }
 0x12e   :  { %v425_v56 = vpop.f32.mrf.mxu0  ;;  %1250 = vset.pattern.permute.xlu0 %v1268_v22 }
 0x12f   :  { %1154 = vmatpush.xpose.msk.msra.mxu1 %vm267_vm0, %v537_v48  ;;  %v426_v5 = vadd.f32 %v1440_v42, %v425_v56  ;;  %v10_v48 = vstv %s1715_s4  ;;  %v553_v56 = vmax.f32 %v424_v47, 0.0  ;;  %v552_v62 = vmax.f32 %v421_v36, 0.0 }
 0x130   :  { %11 = vst [vmem:[#allocation2] sm:$0x1] %v10_v48 }
 0x131   :  { %1183 = vmatpush.xpose.msk.msrb.mxu3 %vm267_vm0, %v574_v50  ;;  %v554_v54 = vmax.f32 %v426_v5, 0.0  ;;  %v593_v50 = vmax.f32 %v524_v61, 0.0 }
 0x133   :  { %1155 = vmatpush.xpose.msk.msra.mxu1 %vm267_vm0, %v536_v59  ;;  %v566_v59 = vmax.f32 %v456_v23, 0.0 }
 0x135   :  { %1184 = vmatpush.xpose.msk.msrb.mxu3 %vm267_vm0, %v573_v3 }
 0x136   :  { %v428_v58 = vpop.f32.mrf.mxu0 }
 0x137   :  { %1156 = vmatpush.xpose.msk.msra.mxu1 %vm267_vm0, %v535_v6  ;;  %v429_v25 = vadd.f32 %v1440_v42, %v428_v58  ;;  %v598_v3 = vld [vmem:[#allocation2] sm:$0x1]  ;;  %v416_v6 = vadd.f32 %v1440_v42, %v1532_v1  ;;  %v514_v58 = vadd.f32 %v1440_v42, %v1512_v38  ;;  %v511_v1 = vadd.f32 %v1440_v42, %v1508_v34 }
 0x138   :  { %601 = vperm.xlu0 %1250, %v598_v3   ;;  %v549_v38 = vmax.f32 %v414_v30, 0.0  ;;  %v504_v34 = vadd.f32 %v1440_v42, %v1483_v11  ;;  %v494_v11 = vadd.f32 %v1440_v42, %v1452_v53 }
 0x139   :  { %1185 = vmatpush.xpose.msk.msrb.mxu3 %vm267_vm0, %v572_v8  ;;  %v555_v40 = vmax.f32 %v429_v25, 0.0  ;;  %v550_v8 = vmax.f32 %v416_v6, 0.0  ;;  %v589_v37 = vmax.f32 %v514_v58, 0.0 }
 0x13a   :  { %v581_v4 = vmax.f32 %v494_v11, 0.0 }
 0x13b   :  { %1157 = vmatpush.xpose.msk.msra.mxu1 %vm267_vm0, %v534_v10  ;;  %v588_v10 = vmax.f32 %v511_v1, 0.0 }
 0x13d   :  { %1186 = vmatpush.xpose.msk.msrb.mxu3 %vm267_vm0, %v571_v15  ;;  %v585_v15 = vmax.f32 %v504_v34, 0.0 }
 0x13e   :  { %v430_v21 = vpop.f32.mrf.mxu0 }
 0x13f   :  { %v431_v26 = vadd.f32 %v1440_v42, %v430_v21  ;;  %1158 = vmatpush.xpose.msk.msra.mxu1 %vm267_vm0, %v533_v18  ;;  %v584_v18 = vmax.f32 %v501_v24, 0.0  ;;  %v582_v21 = vmax.f32 %v496_v43, 0.0 }
 0x141   :  { %v556_v39 = vmax.f32 %v431_v26, 0.0  ;;  %1187 = vmatpush.xpose.msk.msrb.mxu3 %vm267_vm0, %v570_v12 }
 0x142   :  { %1159 = vmatmul.msk.f32.vlgmr.msra.gmra.mxu1 %vm267_vm0, %v1604_v33 }
 0x143   :  { %1194 = vmatpush.xpose.msk.msrb.mxu1 %vm267_vm0, %v596_v20  ;;  %1168 = vmatpush.xpose.msk.msrb.mxu2 %vm267_vm0, %v556_v39  ;;  %v583_v20 = vmax.f32 %v499_v17, 0.0 }
 0x145   :  { %1188 = vmatpush.xpose.msk.msrb.mxu3 %vm267_vm0, %v569_v0 }
 0x147   :  { %1195 = vmatpush.xpose.msk.msrb.mxu1 %vm267_vm0, %v595_v29  ;;  %1169 = vmatpush.xpose.msk.msrb.mxu2 %vm267_vm0, %v555_v40 }
 0x149   :  { %1189 = vmatpush.xpose.msk.msrb.mxu3 %vm267_vm0, %v568_v45 }
 0x14b   :  { %1196 = vmatpush.xpose.msk.msrb.mxu1 %vm267_vm0, %v594_v44  ;;  %1170 = vmatpush.xpose.msk.msrb.mxu2 %vm267_vm0, %v554_v54 }
 0x14d   :  { %1190 = vmatpush.xpose.msk.msrb.mxu3 %vm267_vm0, %v567_v51 }
 0x14f   :  { %1197 = vmatpush.xpose.msk.msrb.mxu1 %vm267_vm0, %v593_v50  ;;  %1171 = vmatpush.xpose.msk.msrb.mxu2 %vm267_vm0, %v553_v56 }
 0x151   :  { %1191 = vmatpush.xpose.msk.msrb.mxu3 %vm267_vm0, %v566_v59 }
 0x153   :  { %1198 = vmatpush.xpose.msk.msrb.mxu1 %vm267_vm0, %v592_v2  ;;  %1172 = vmatpush.xpose.msk.msrb.mxu2 %vm267_vm0, %v552_v62 }
 0x155   :  { %1192 = vmatpush.xpose.msk.msrb.mxu3 %vm267_vm0, %v565_v9 }
 0x157   :  { %1199 = vmatpush.xpose.msk.msrb.mxu1 %vm267_vm0, %v591_v41  ;;  %1173 = vmatpush.xpose.msk.msrb.mxu2 %vm267_vm0, %v551_v13 }
 0x158   :  { %1193 = vmatmul.msk.f32.vlgmr.msrb.gmra.mxu3 %vm267_vm0, %v1604_v33 }
 0x15b   :  { %1200 = vmatpush.xpose.msk.msrb.mxu1 %vm267_vm0, %v590_v7  ;;  %1174 = vmatpush.xpose.msk.msrb.mxu2 %vm267_vm0, %v550_v8 }
 0x15f   :  { %1201 = vmatpush.xpose.msk.msrb.mxu1 %vm267_vm0, %v589_v37  ;;  %1175 = vmatpush.xpose.msk.msrb.mxu2 %vm267_vm0, %v549_v38 }
 0x162   :  { %1176 = vmatmul.msk.f32.vlgmr.msrb.gmra.mxu2 %vm267_vm0, %v1604_v33 }
 0x163   :  { %1202 = vmatpush.xpose.msk.msrb.mxu1 %vm267_vm0, %v588_v10 }
 0x167   :  { %1203 = vmatpush.xpose.msk.msrb.mxu1 %vm267_vm0, %v587_v14 }
 0x16b   :  { %1204 = vmatpush.xpose.msk.msrb.mxu1 %vm267_vm0, %v586_v32 }
 0x16f   :  { %1205 = vmatpush.xpose.msk.msrb.mxu1 %vm267_vm0, %v585_v15 }
 0x173   :  { %1206 = vmatpush.xpose.msk.msrb.mxu1 %vm267_vm0, %v584_v18 }
 0x177   :  { %1207 = vmatpush.xpose.msk.msrb.mxu1 %vm267_vm0, %v583_v20 }
 0x17b   :  { %1208 = vmatpush.xpose.msk.msrb.mxu1 %vm267_vm0, %v582_v21 }
 0x17f   :  { %1209 = vmatpush.xpose.msk.msrb.mxu1 %vm267_vm0, %v581_v4 }
 0x182   :  { %1210 = vmatmul.msk.f32.vlgmr.msrb.gmra.mxu1 %vm267_vm0, %v1604_v33 }
 0x1aa   :  { %v602_v63 = vpop.permute.xlu0 %601 }
 0x1ab   :  { %v604_v28 = vperm.slane %v602_v63, 0 }
 0x1bf   :  { %v817_v25 = vpop.f32.mrf.mxu1 }
 0x1c0   :  { %v818_v39 = vadd.f32 %v817_v25, %v604_v28 }
 0x1c2   :  { %v880_v42 = vsub.f32 0.0, %v818_v39 }
 0x1c4   :  { %v884_v40 = vmul.f32 1.442695, %v880_v42 }
 0x1db   :  { %v857_v12 = vpop.f32.mrf.mxu3 }
 0x1dc   :  { %v858_v26 = vadd.f32 %v857_v12, %v604_v28  ;;  %v966_v12 = vlaneseq }
 0x1de   :  { %v882_v35 = vsub.f32 0.0, %v858_v26 }
 0x1e0   :  { %v888_v0 = vmul.f32 1.442695, %v882_v35 }
 0x1e5   :  { %v837_v60 = vpop.f32.mrf.mxu2 }
 0x1e6   :  { %v838_v27 = vadd.f32 %v837_v60, %v604_v28 }
 0x1e8   :  { %v881_v29 = vsub.f32 0.0, %v838_v27 }
 0x1ea   :  { %v886_v53 = vmul.f32 1.442695, %v881_v29 }
 0x1ec   :  { %1252 = vpow2.f32 %v886_v53 }
 0x1ed   :  { %1254 = vpow2.f32 %v888_v0 }
 0x1ee   :  { %1256 = vpow2.f32 %v884_v40 }
 0x1f2   :  { %v1253_v5 = vpop.eup %1252 }
 0x1f3   :  { %v1255_v61 = vpop.eup %1254  ;;  %v893_v44 = vadd.f32 1.0, %v1253_v5 }
 0x1f4   :  { %v1257_v33 = vpop.eup %1256  ;;  %v894_v31 = vadd.f32 1.0, %v1255_v61 }
 0x1f5   :  { %v892_v45 = vadd.f32 1.0, %v1257_v33  ;;  %1258 = vrcp.f32 %v893_v44  ;;  %vm915_vm1 = vweird.f32 %v893_v44  ;;  %v921_v41 = vand.u32 2147483648, %v893_v44 }
 0x1f6   :  { %1260 = vrcp.f32 %v894_v31  ;;  %v919_v6 = vand.u32 2147483647, %v893_v44  ;;  %vm929_vm3 = vweird.f32 %v894_v31  ;;  %v933_v7 = vand.u32 2147483647, %v894_v31 }
 0x1f7   :  { %1262 = vrcp.f32 %v892_v45  ;;  %v935_v30 = vand.u32 2147483648, %v894_v31  ;;  %vm901_vm6 = vweird.f32 %v892_v45  ;;  %v905_v37 = vand.u32 2147483647, %v892_v45 }
 0x1f8   :  { %v907_v38 = vand.u32 2147483648, %v892_v45  ;;  %v922_v49 = vor.u32 1.1754944e-38, %v921_v41  ;;  %vm920_vm9 = vcmp.eq.f32.partialorder %v919_v6, 8.507059e+37  ;;  %vm934_vm11 = vcmp.eq.f32.partialorder %v933_v7, 8.507059e+37 }
 0x1f9   :  { %v936_v24 = vor.u32 1.1754944e-38, %v935_v30  ;;  %vm906_vm13 = vcmp.eq.f32.partialorder %v905_v37, 8.507059e+37 }
 0x1fa   :  { %v908_v20 = vor.u32 1.1754944e-38, %v907_v38 }
 0x1fb   :  { %v1259_v50 = vpop.eup %1258 }
 0x1fc   :  { %v1261_v23 = vpop.eup %1260  ;;  %v911_v36 = vmul.f32 %v1259_v50, %v893_v44  ;;  %vm916_vm2 = vweird.f32 %v1259_v50 }
 0x1fd   :  { %v1263_v51 = vpop.eup %1262  ;;  %v925_v56 = vmul.f32 %v1261_v23, %v894_v31  ;;  %vm930_vm4 = vweird.f32 %v1261_v23  ;;  %vm1690_vm5 = vmor %vm915_vm1, %vm916_vm2  ;;  %vm959_vm1 = vcmask 1040384   ;;  %vm961_vm2 = vcmask 1042434  }
 0x1fe   :  { %v897_v57 = vmul.f32 %v1263_v51, %v892_v45  ;;  %v912_v46 = vsub.f32 1.0, %v911_v36  ;;  %vm902_vm7 = vweird.f32 %v1263_v51  ;;  %vm1694_vm8 = vmor %vm929_vm3, %vm930_vm4  ;;  %vm963_vm3 = vcmask 1041408  }
 0x1ff   :  { %v877_v47 = vpop.f32.mrf.mxu1  ;;  %v926_v16 = vsub.f32 1.0, %v925_v56  ;;  %vm1700_vm10 = vmor %vm901_vm6, %vm902_vm7  ;;  %vm968_vm4 = vcmp.lt.s32.totalorder %v966_v12, 512 }
 0x200   :  { %v878_v54 = vadd.f32 %v877_v47, %v604_v28  ;;  %v898_v62 = vsub.f32 1.0, %v897_v57  ;;  %v913_v22 = vmul.f32 %v1259_v50, %v912_v46 }
 0x201   :  { %v927_v3 = vmul.f32 %v1261_v23, %v926_v16 }
 0x202   :  { %v883_v48 = vsub.f32 0.0, %v878_v54  ;;  %v899_v52 = vmul.f32 %v1263_v51, %v898_v62  ;;  %v914_v9 = vadd.f32 %v1259_v50, %v913_v22 }
 0x203   :  { %v928_v8 = vadd.f32 %v1261_v23, %v927_v3 }
 0x204   :  { %v890_v19 = vmul.f32 1.442695, %v883_v48  ;;  %v900_v55 = vadd.f32 %v1263_v51, %v899_v52  ;;  %v918_v14 = vsel %vm1690_vm5, %v1259_v50, %v914_v9 }
 0x205   :  { %v932_v17 = vsel %vm1694_vm8, %v1261_v23, %v928_v8  ;;  %v923_v11 = vsel %vm920_vm9, %v922_v49, %v918_v14 }
 0x206   :  { %1264 = vpow2.f32 %v890_v19  ;;  %v904_v21 = vsel %vm1700_vm10, %v1263_v51, %v900_v55  ;;  %v937_v63 = vsel %vm934_vm11, %v936_v24, %v932_v17  ;;  %v956_v25 = vrot.slane %v923_v11, 7 }
 0x207   :  { %v909_v26 = vsel %vm906_vm13, %v908_v20, %v904_v21  ;;  %v957_v27 = vrot.slane %v937_v63, 6 }
 0x208   :  { %v960_v35 = vsel %vm959_vm1, %v909_v26, %v956_v25 }
 0x20c   :  { %v1265_v2 = vpop.eup %1264 }
 0x20d   :  { %v895_v59 = vadd.f32 1.0, %v1265_v2 }
 0x20f   :  { %1266 = vrcp.f32 %v895_v59  ;;  %v949_v15 = vand.u32 2147483648, %v895_v59  ;;  %v947_v43 = vand.u32 2147483647, %v895_v59  ;;  %vm943_vm14 = vweird.f32 %v895_v59 }
 0x211   :  { %v950_v28 = vor.u32 1.1754944e-38, %v949_v15  ;;  %vm948_vm0 = vcmp.eq.f32.partialorder %v947_v43, 8.507059e+37 }
 0x215   :  { %v1267_v13 = vpop.eup %1266 }
 0x216   :  { %v939_v1 = vmul.f32 %v1267_v13, %v895_v59  ;;  %vm944_vm12 = vweird.f32 %v1267_v13 }
 0x217   :  { %vm945_vm15 = vmor %vm943_vm14, %vm944_vm12 }
 0x218   :  { %v940_v34 = vsub.f32 1.0, %v939_v1 }
 0x21a   :  { %v941_v18 = vmul.f32 %v1267_v13, %v940_v34 }
 0x21c   :  { %v942_v4 = vadd.f32 %v1267_v13, %v941_v18 }
 0x21e   :  { %v946_v60 = vsel %vm945_vm15, %v1267_v13, %v942_v4 }
 0x21f   :  { %v951_v39 = vsel %vm948_vm0, %v950_v28, %v946_v60 }
 0x220   :  { %v958_v29 = vrot.slane %v951_v39, 5 }
 0x222   :  { %v962_v42 = vsel %vm961_vm2, %v957_v27, %v958_v29 }
 0x223   :  { %v964_v53 = vsel %vm963_vm3, %v960_v35, %v962_v42 }
 0x224   :  { %970 = vst.msk [vmem:[%s1716_s5] sm:$0xf] %vm968_vm4, %v964_v53 }

</bundles_post_ra>
